<compile_context>
chip_gen: v6e
topology: v6e:2x2x1
jax: 0.10.0
libtpu: 0.0.40
codegen_flags: <defaults>
</compile_context>

<pallas_src>
import math
import functools

import jax
import jax.numpy as jnp
from jax import lax
from jax.experimental import pallas as pl
from jax.experimental.pallas import tpu as pltpu


def _pe_dropout_kernel(seed_ref, trig_ref, x_ref, o_ref, *, p):
    """One (tS, B*D) tile: out = dropout(x + pe), pe computed analytically."""
    tS, BD = x_ref.shape
    tile_start = pl.program_id(0) * tS

    row = lax.broadcasted_iota(jnp.int32, (tS, BD), 0)

    # --- positional encoding: pe[s, b*D + d] = sin(pos * freq[d] + phase[d]) ------
    # (phase = 0 for even d -> sin, phase = pi/2 for odd d -> cos)
    pos = (tile_start + row).astype(jnp.float32)          # global sequence position
    freq = trig_ref[0:1, :]                                # (1, BD), sublane-broadcast
    phase = trig_ref[1:2, :]                               # (1, BD)
    pe = jnp.sin(pos * freq + phase)                       # EUP slot (free alongside VPU)

    y = x_ref[...].astype(jnp.float32) + pe

    # --- inverted dropout via counter-based hash (integer threshold compare) ------
    if p > 0.0:
        col = lax.broadcasted_iota(jnp.int32, (tS, BD), 1)
        gidx = (tile_start + row).astype(jnp.uint32) * jnp.uint32(BD) \
            + col.astype(jnp.uint32)                       # unique global element id
        h = gidx ^ (seed_ref[0].astype(jnp.uint32) * jnp.uint32(0x9E3779B1))
        # murmur3-finalizer-style mix (a handful of VPU int ops; kernel stays HBM-bound)
        h = (h ^ (h >> 16)) * jnp.uint32(0x85EBCA6B)
        h = (h ^ (h >> 13)) * jnp.uint32(0xC2B2AE35)
        h = h ^ (h >> 16)
        thresh = jnp.uint32(min(int(round(p * 4294967296.0)), 4294967295))
        keep = h >= thresh                                 # P(keep) = 1 - p
        y = jnp.where(keep, y * jnp.float32(1.0 / (1.0 - p)), jnp.float32(0.0))

    o_ref[...] = y.astype(o_ref.dtype)


def _make_freq_phase(d_model: int, batch: int):
    """Per-lane frequency/phase table for the flattened (S, B*D) layout."""
    d = jnp.arange(d_model)
    k = (d // 2) * 2                                              # even base index
    freq_d = jnp.exp(-k.astype(jnp.float32) * (math.log(10000.0) / d_model))
    phase_d = jnp.where(d % 2 == 0, 0.0, math.pi / 2.0).astype(jnp.float32)
    freq = jnp.tile(freq_d, (batch,))                             # lane l = b*D + d
    phase = jnp.tile(phase_d, (batch,))
    return jnp.stack([freq, phase], axis=0)                       # (2, B*D)


def positional_encoding_forward(x, *, p: float = 0.1, seed: int = 0,
                                tile_rows: int | None = None):
    """x: [seq_len, batch, d_model]. Returns dropout(x + pe[:seq_len]) like PyTorch."""
    S, B, D = x.shape
    BD = B * D
    x2 = x.reshape(S, BD)                     # free reshape -> lane-dense 2D slab

    if tile_rows is None:
        # Keep one tile buffer around <=2 MiB so double-buffered x + out (~4 tiles)
        # fit comfortably under v5e's 16 MiB default scoped VMEM (v6e/v7x have more).
        budget = 2 * 1024 * 1024
        tS = max(8, (budget // (BD * x2.dtype.itemsize)) // 8 * 8)
    else:
        tS = tile_rows
    tS = min(tS, S)                           # tS is a multiple of 8 or == S

    seed_arr = jnp.array([seed], dtype=jnp.int32)
    trig = _make_freq_phase(D, B)             # tiny, constant block -> DMA'd once

    kernel = functools.partial(_pe_dropout_kernel, p=float(p))
    out2 = pl.pallas_call(
        kernel,
        out_shape=jax.ShapeDtypeStruct((S, BD), x.dtype),
        grid_spec=pltpu.PrefetchScalarGridSpec(
            num_scalar_prefetch=1,            # seed -> SMEM, passed to index_maps
            grid=(pl.cdiv(S, tS),),
            in_specs=[
                pl.BlockSpec((2, BD), lambda i, seed: (0, 0)),    # freq/phase (const)
                pl.BlockSpec((tS, BD), lambda i, seed: (i, 0)),   # x tile
            ],
            out_specs=pl.BlockSpec((tS, BD), lambda i, seed: (i, 0)),
        ),
        compiler_params=pltpu.CompilerParams(
            dimension_semantics=("parallel",),   # sharded across v7x's 2 TensorCores
        ),
        # input_output_aliases={2: 0} could donate x if the caller no longer needs it.
    )(seed_arr, trig, x2)

    return out2.reshape(S, B, D)


def make_positional_encoding(max_len: int, d_model: int, dtype=jnp.float32):
    """Reference-only: the PyTorch `pe` buffer squeezed to [max_len, d_model]."""
    position = jnp.arange(max_len, dtype=jnp.float32)[:, None]
    div_term = jnp.exp(
        jnp.arange(0, d_model, 2, dtype=jnp.float32) * (-math.log(10000.0) / d_model)
    )
    pe = jnp.zeros((max_len, d_model), dtype=jnp.float32)
    pe = pe.at[:, 0::2].set(jnp.sin(position * div_term))
    pe = pe.at[:, 1::2].set(jnp.cos(position * div_term))
    return pe.astype(dtype)


if __name__ == "__main__":
    # [seq_len, batch, d_model] as implied by the module's forward.
    S, B, D = 8, 2, 32
    MAX_LEN = 5000

    key = jax.random.PRNGKey(0)
    x = jax.random.normal(key, (S, B, D), dtype=jnp.float32)
    pe_full = make_positional_encoding(MAX_LEN, D)

    # Deterministic part (eval mode, dropout disabled) vs. pure-JAX reference.
    out_eval = positional_encoding_forward(x, p=0.0)
    jax.block_until_ready(out_eval)
    ref = x + pe_full[:S][:, None, :]
    assert jnp.allclose(out_eval, ref, atol=1e-4, rtol=1e-4), "PE-add mismatch"

    # Multi-tile grid exercise (forces grid > 1 with a small tile) on the eval path.
    S2 = 64
    x2 = jax.random.normal(jax.random.PRNGKey(1), (S2, B, D), dtype=jnp.float32)
    out_eval2 = positional_encoding_forward(x2, p=0.0, tile_rows=16)
    jax.block_until_ready(out_eval2)
    ref2 = x2 + pe_full[:S2][:, None, :]
    assert jnp.allclose(out_eval2, ref2, atol=1e-4, rtol=1e-4), "multi-tile mismatch"

    # Full forward with dropout p=0.1 (deterministic in-kernel hash RNG).
    # TODO(synk): dropout mask stream intentionally does not replicate torch's RNG.
    out_train = positional_encoding_forward(x, p=0.1, seed=0)
    jax.block_until_ready(out_train)
    assert out_train.shape == (S, B, D)
    assert bool(jnp.all(jnp.isfinite(out_train)))

    print("KERNEL_OK")
</pallas_src>

<mosaic_0001>
module attributes {stable_mosaic.version = 11 : i64} {
  func.func @_pe_dropout_kernel(%arg0: i32, %arg1: memref<1xi32, #tpu.memory_space<smem>>, %arg2: memref<2x64xf32, #tpu.memory_space<vmem>>, %arg3: memref<8x64xf32, #tpu.memory_space<vmem>>, %arg4: memref<8x64xf32, #tpu.memory_space<vmem>>) attributes {dimension_semantics = [#tpu.dimension_semantics<parallel>], iteration_bounds = array<i64: 1>, scalar_prefetch = 1 : i64, scratch_operands = 0 : i64, tpu.core_type = #tpu.core_type<tc>, window_params = [{pipeline_mode = #tpu.pipeline_mode<synchronous>, transform_indices = @transform_0, window_bounds = array<i64: 2, 64>}, {transform_indices = @transform_1, window_bounds = array<i64: 8, 64>}, {transform_indices = @transform_2, window_bounds = array<i64: 8, 64>}]} {
    %c8_i32 = arith.constant 8 : i32
    %0 = arith.muli %arg0, %c8_i32 : i32
    %1 = tpu.iota {dimensions = array<i32: 0>} : vector<8x64xi32>
    %2 = vector.broadcast %0 : i32 to vector<8x64xi32>
    %3 = arith.addi %2, %1 : vector<8x64xi32>
    %4 = arith.sitofp %3 : vector<8x64xi32> to vector<8x64xf32>
    %c0 = arith.constant 0 : index
    %c0_0 = arith.constant 0 : index
    %5 = vector.load %arg2[%c0, %c0_0] : memref<2x64xf32, #tpu.memory_space<vmem>>, vector<1x64xf32>
    %c1 = arith.constant 1 : index
    %c0_1 = arith.constant 0 : index
    %6 = vector.load %arg2[%c1, %c0_1] : memref<2x64xf32, #tpu.memory_space<vmem>>, vector<1x64xf32>
    %7 = vector.broadcast %5 : vector<1x64xf32> to vector<8x64xf32>
    %8 = arith.mulf %4, %7 : vector<8x64xf32>
    %9 = vector.broadcast %6 : vector<1x64xf32> to vector<8x64xf32>
    %10 = arith.addf %8, %9 : vector<8x64xf32>
    %11 = math.sin %10 : vector<8x64xf32>
    %c0_2 = arith.constant 0 : index
    %c0_3 = arith.constant 0 : index
    %12 = vector.load %arg3[%c0_2, %c0_3] : memref<8x64xf32, #tpu.memory_space<vmem>>, vector<8x64xf32>
    %13 = arith.addf %12, %11 : vector<8x64xf32>
    %c0_4 = arith.constant 0 : index
    %c0_5 = arith.constant 0 : index
    %14 = vector.load %arg4[%c0_4, %c0_5] : memref<8x64xf32, #tpu.memory_space<vmem>>, vector<8x64xf32>
    tpu.vector_store %arg4[%c0_4, %c0_5], %13 {strides = array<i32>} : memref<8x64xf32, #tpu.memory_space<vmem>>, vector<8x64xf32>,
    return
  }
  func.func @transform_0(%arg0: i32, %arg1: memref<1xi32, #tpu.memory_space<smem>>) -> (i32, i32) {
    %c0_i32 = arith.constant 0 : i32
    %c0_i32_0 = arith.constant 0 : i32
    %c0_i32_1 = arith.constant 0 : i32
    return %c0_i32, %c0_i32_0 : i32, i32
  }
  func.func @transform_1(%arg0: i32, %arg1: memref<1xi32, #tpu.memory_space<smem>>) -> (i32, i32) {
    %c0_i32 = arith.constant 0 : i32
    %c0_i32_0 = arith.constant 0 : i32
    return %arg0, %c0_i32 : i32, i32
  }
  func.func @transform_2(%arg0: i32, %arg1: memref<1xi32, #tpu.memory_space<smem>>) -> (i32, i32) {
    %c0_i32 = arith.constant 0 : i32
    %c0_i32_0 = arith.constant 0 : i32
    return %arg0, %c0_i32 : i32, i32
  }
}

</mosaic_0001>

<bundles_post_ra>
// kernel: tpu_custom_call.1
= control target key start
LH: loop header
LB: loop body
LE: loop exit
PB: predicated region body
PF: predicated region fallthrough
CT: control target
= control target key end

     0   :  { %9 = vsyncpa [#allocation5], 0  ;;  %s294_s0 = inlined_call_operand.<no memory space> [shape: s32[1], index: 0, kind: input, shape index: {}]   ;;  %s295_s1 = inlined_call_operand.vmem [shape: f32[2,64], index: 1, kind: input, shape index: {}]   ;;  %s296_s2 = inlined_call_operand.hbm [shape: f32[8,64], index: 2, kind: input, shape index: {}]   ;;  %s297_s3 = inlined_call_operand.hbm [shape: f32[8,64], index: 3, kind: output, shape index: {}]  }
   0x1   :  { %10 = vsyncpa [#allocation6], 0  ;;  %s233_s12 = smov [#allocation4]  }
   0x2   :  { %s19_s13 = sshll.u32 %s233_s12, 4  ;;  %s20_s13 = int_to_ptr.vmem [resolvable:$true] %s19_s13 }
   0x3   :  { %s197_s14 = scalar_lea.vmem %s20_s13, 128  ;;  %p202_p1 = scmp.lt.s32.totalorder %s20_s13, %s20_s13 }
   0x4   :  { %p198_p0 = scmp.ne.s32.totalorder %s20_s13, %s197_s14  ;;  %p203_p2 = scmp.lt.s32.totalorder %s197_s14, %s197_s14 }
   0x6   :  { %p204_p3 = por %p203_p2, %p202_p1 }
   0x8   :  { %p205_p4 = pnand %p204_p3, %p198_p0 }
   0xa   :  { %208 = shalt.err (!%p205_p4)
}
   0xb   :  { %22 = dma.hbm_to_vmem [thread:$0]  %s296_s2, 128, %s20_s13, [#allocation5]  }
   0xc   :  { %229 = dma.done.wait [#allocation5], 128  }
   0xd   :  { %230 = vsyncadd [#allocation5], 4294967168  ;;  %v27_v0 = vlaneseq  ;;  %v167_v3 = vld [vmem:[%s295_s1] ss:$0 sm:$0xff]  ;;  %v168_v4 = vld [vmem:[%s295_s1 + $0x1] ss:$0 sm:$0xff] }
   0xe   :  { %v234_v18 = vmov 683565275   ;;  %v235_v20 = vmov 2475754826   ;;  %v236_v22 = vmov 2131351028  }
   0xf   :  { %v28_v1 = vshrl.u32 %v27_v0, 7  ;;  %v237_v24 = vmov 2102212464   ;;  %v238_v26 = vmov 920167782   ;;  %s240_s1 = smov [#allocation7]  }
  0x10   :  { %v239_v33 = vmov 1326507024   ;;  %s158_s2 = sshll.u32 %s240_s1, 4  ;;  %vm150_vm13 = vcmask 523264   ;;  %s159_s2 = int_to_ptr.vmem [resolvable:$true] %s158_s2 }
  0x11   :  { %v31_v2 = vcvt.s32.f32 %v28_v1  ;;  %s209_s20 = scalar_lea.vmem %s159_s2, 128  ;;  %p214_p6 = scmp.lt.s32.totalorder %s159_s2, %s159_s2 }
  0x12   :  { %p210_p5 = scmp.ne.s32.totalorder %s159_s2, %s209_s20  ;;  %p215_p7 = scmp.lt.s32.totalorder %s209_s20, %s209_s20 }
  0x13   :  { %v38_v5 = vmul.f32 %v167_v3, %v31_v2 }
  0x14   :  { %p216_p8 = por %p215_p7, %p214_p6 }
  0x15   :  { %v270_v6 = vadd.f32 %v168_v4, %v38_v5 }
  0x16   :  { %p217_p9 = pnand %p216_p8, %p210_p5 }
  0x17   :  { %v47_v7 = vand.u32 2139095040, %v270_v6  ;;  %v44_v9 = vand.u32 2147483647, %v270_v6  ;;  %vm46_vm7 = vcmp.lt.s32.totalorder %v270_v6, 0  ;;  %vm136_vm12 = vweird.f32 %v270_v6 }
  0x19   :  { %v48_v8 = vshrl.u32 %v47_v7, 23  ;;  %v51_v12 = vand.u32 8388607, %v44_v9  ;;  %vm45_vm8 = vcmp.le.f32.partialorder %v44_v9, 0.7853982 }
  0x1b   :  { %v169_v10 = vadd.s32 4294967169, %v48_v8  ;;  %v52_v15 = vor.u32 8388608, %v51_v12 }
  0x1d   :  { %v54_v11 = vadd.s32 1, %v169_v10  ;;  %v92_v35 = vshll.u32 %v52_v15, 8 }
  0x1f   :  { %vm55_vm0 = vcmp.gt.s32.totalorder %v54_v11, 0 }
  0x20   :  { %v56_v13 = vsel %vm55_vm0, %v54_v11, 0 }
  0x21   :  { %v58_v14 = vand.u32 31, %v56_v13  ;;  %v57_v16 = vshrl.u32 %v56_v13, 5 }
  0x23   :  { %v59_v17 = vsub.s32 32, %v58_v14  ;;  %v61_v19 = vshll.u32 %v234_v18, %v58_v14  ;;  %v64_v21 = vshll.u32 %v235_v20, %v58_v14  ;;  %v67_v23 = vshll.u32 %v236_v22, %v58_v14 }
  0x24   :  { %v70_v25 = vshll.u32 %v237_v24, %v58_v14  ;;  %v73_v27 = vshll.u32 %v238_v26, %v58_v14  ;;  %vm76_vm1 = vcmp.lt.s32.totalorder %v57_v16, 1  ;;  %vm79_vm2 = vcmp.lt.s32.totalorder %v57_v16, 4 }
  0x25   :  { %v60_v28 = vshrl.u32 %v234_v18, %v59_v17  ;;  %v62_v29 = vshrl.u32 %v235_v20, %v59_v17  ;;  %v65_v30 = vshrl.u32 %v236_v22, %v59_v17  ;;  %v68_v31 = vshrl.u32 %v237_v24, %v59_v17 }
  0x26   :  { %v71_v32 = vshrl.u32 %v238_v26, %v59_v17  ;;  %v74_v34 = vshrl.u32 %v239_v33, %v59_v17  ;;  %vm77_vm3 = vcmp.lt.s32.totalorder %v57_v16, 2  ;;  %vm78_vm4 = vcmp.lt.s32.totalorder %v57_v16, 3  ;;  %v148_v33 = vld [vmem:[#allocation4] sm:$0xff] }
  0x27   :  { %v63_v36 = vor.u32 %v62_v29, %v61_v19  ;;  %v66_v37 = vor.u32 %v65_v30, %v64_v21  ;;  %v69_v38 = vor.u32 %v68_v31, %v67_v23 }
  0x28   :  { %v72_v39 = vor.u32 %v71_v32, %v70_v25  ;;  %v75_v40 = vor.u32 %v74_v34, %v73_v27 }
  0x29   :  { %v80_v41 = vsel %vm76_vm1, %v60_v28, %v63_v36  ;;  %v81_v42 = vsel %vm79_vm2, %v69_v38, 2102212464  ;;  %v84_v43 = vsel %vm76_vm1, %v63_v36, %v66_v37  ;;  %v88_v44 = vsel %vm76_vm1, %v66_v37, %v69_v38 }
  0x2a   :  { %v82_v45 = vsel %vm78_vm4, %v66_v37, %v81_v42  ;;  %v85_v46 = vsel %vm79_vm2, %v72_v39, 920167782  ;;  %v89_v47 = vsel %vm79_vm2, %v75_v40, 1326507024 }
  0x2b   :  { %v86_v48 = vsel %vm78_vm4, %v69_v38, %v85_v46  ;;  %v90_v49 = vsel %vm78_vm4, %v72_v39, %v89_v47  ;;  %v83_v50 = vsel %vm77_vm3, %v80_v41, %v82_v45 }
  0x2c   :  { %v87_v51 = vsel %vm77_vm3, %v84_v43, %v86_v48  ;;  %v91_v52 = vsel %vm77_vm3, %v88_v44, %v90_v49  ;;  %v99_v57 = vmul.u32 %v92_v35, %v83_v50 }
  0x2d   :  { %v276_v53 = vmul.u32.u64.low %v92_v35, %v91_v52  ;;  %v277_v54 = vmul.u32.u64.high %v92_v35, %v91_v52, %v276_v53  ;;  %v279_v55 = vmul.u32.u64.low %v92_v35, %v87_v51  ;;  %v280_v56 = vmul.u32.u64.high %v92_v35, %v87_v51, %v279_v55 }
  0x2f   :  { %vm101_vm5 = vc.u32 %v277_v54, %v279_v55  ;;  %v102_v58 = vadd.s32 1, %v280_v56  ;;  %v100_v5 = vadd.s32 %v279_v55, %v277_v54 }
  0x31   :  { %v103_v59 = vsel %vm101_vm5, %v102_v58, %v280_v56 }
  0x32   :  { %v104_v60 = vadd.s32 %v103_v59, %v99_v57 }
  0x34   :  { %v105_v61 = vadd.s32 536870912, %v104_v60 }
  0x36   :  { %v106_v62 = vshrl.u32 %v105_v61, 30 }
  0x38   :  { %v107_v63 = vshll.u32 %v106_v62, 30  ;;  %v130_v20 = vsub.s32 4, %v106_v62 }
  0x3a   :  { %v108_v0 = vsub.s32 %v104_v60, %v107_v63  ;;  %v131_v23 = vsel %vm46_vm7, %v130_v20, %v106_v62 }
  0x3b   :  { %v133_v25 = vsel %vm45_vm8, 0, %v131_v23 }
  0x3c   :  { %v110_v1 = vsub.s32 0, %v108_v0  ;;  %v137_v26 = vadd.s32 3, %v133_v25 }
  0x3e   :  { %v170_v2 = vmin.u32 %v110_v1, %v108_v0  ;;  %v138_v27 = vand.u32 3, %v137_v26 }
  0x40   :  { %v112_v3 = vclz %v170_v2  ;;  %vm143_vm9 = vcmp.eq.s32.totalorder %v138_v27, 2  ;;  %vm140_vm10 = vcmp.eq.s32.totalorder %v138_v27, 0  ;;  %vm139_vm11 = vcmp.lt.s32.totalorder %v138_v27, 2 }
  0x42   :  { %v171_v4 = vadd.s32 4294967294, %v112_v3 }
  0x44   :  { %vm172_vm6 = vcmp.lt.s32.totalorder %v171_v4, 0 }
  0x45   :  { %v115_v7 = vsel %vm172_vm6, 0, %v171_v4 }
  0x46   :  { %v116_v8 = vsub.s32 32, %v115_v7  ;;  %v117_v10 = vshll.u32 %v108_v0, %v115_v7  ;;  %v120_v11 = vsub.s32 4294967266, %v115_v7 }
  0x48   :  { %v118_v12 = vshrl.u32 %v100_v5, %v116_v8  ;;  %v121_v13 = vadd.s32 127, %v120_v11 }
  0x4a   :  { %v119_v14 = vor.u32 %v118_v12, %v117_v10  ;;  %v122_v15 = vshll.u32 %v121_v13, 23 }
  0x4c   :  { %v123_v16 = vor.u32 4788187, %v122_v15  ;;  %v126_v17 = vcvt.s32.f32 %v119_v14 }
  0x4e   :  { %v124_v18 = vand.u32 2147483647, %v123_v16 }
  0x50   :  { %v127_v19 = vmul.f32 %v126_v17, %v124_v18 }
  0x52   :  { %v128_v21 = vxor.u32 2147483648, %v127_v19 }
  0x54   :  { %v129_v22 = vsel %vm46_vm7, %v128_v21, %v127_v19 }
  0x55   :  { %v132_v24 = vsel %vm45_vm8, %v270_v6, %v129_v22 }
  0x56   :  { %185 = vcosq.f32 %v132_v24 }
  0x57   :  { %187 = vsinq.f32 %v132_v24 }
  0x63   :  { %v186_v28 = vpop.eup %185 }
  0x64   :  { %v188_v29 = vpop.eup %187  ;;  %v144_v30 = vxor.u32 2147483648, %v186_v28 }
  0x65   :  { %v141_v31 = vxor.u32 2147483648, %v188_v29 }
  0x66   :  { %v145_v9 = vsel %vm143_vm9, %v144_v30, %v188_v29 }
  0x67   :  { %v142_v32 = vsel %vm140_vm10, %v186_v28, %v141_v31 }
  0x68   :  { %v146_v34 = vsel %vm139_vm11, %v142_v32, %v145_v9 }
  0x69   :  { %v147_v35 = vsel %vm136_vm12, nan, %v146_v34 }
  0x6a   :  { %v149_v36 = vadd.f32 %v148_v33, %v147_v35 }
  0x6c   :  { %151 = vst.msk [vmem:[#allocation7] sm:$0xff] %vm150_vm13, %v149_v36 }
  0x6d   :  { %220 = shalt.err (!%p217_p9)
}
  0x6e   :  { %161 = dma.vmem_to_hbm [thread:$0]  %s159_s2, 128, %s297_s3, [#allocation6]  }
  0x6f   :  { %231 = dma.done.wait [#allocation6], 128  }
  0x70   :  { %232 = vsyncadd [#allocation6], 4294967168 }
  0x71   :  { %165 = vsyncpa [#allocation5], 1 }
  0x72   :  { %166 = vsyncpa [#allocation6], 1 }

</bundles_post_ra>
